<compile_context>
chip_gen: v6e
topology: v6e:2x2x1
jax: 0.10.0
libtpu: 0.0.40
codegen_flags: <defaults>
</compile_context>

<pallas_src>
import functools

import jax
import jax.numpy as jnp
from jax import lax
from jax.experimental import pallas as pl
from jax.experimental.pallas import tpu as pltpu

EPS = 1e-6
_MIB = 1024 * 1024
_FUSED_VMEM_GATE = 20 * _MIB     # conservative: fits v7x scoped VMEM with slack
_VMEM_LIMIT_CAP = 48 * _MIB      # never request more than v7x can plausibly give


def _pad8(c):
    return ((c + 7) // 8) * 8


def _pick_tile(n, c, max_tile_bytes=4 * _MIB):
    """Largest lane-aligned (multiple of 128) N-tile under a byte cap."""
    if n <= 128:
        return n                                      # block dim == full dim is legal
    c_pad = _pad8(c)
    candidates = [t for t in (128, 256, 512, 1024, 2048, 4096, 8192)
                  if t <= n and c_pad * t * 4 <= max_tile_bytes]
    if not candidates:
        return 128
    divisors = [t for t in candidates if n % t == 0]  # avoid masked-tail work
    return max(divisors) if divisors else max(candidates)


def _vmem_limit(need_bytes):
    return int(min(max(2 * need_bytes, 32 * _MIB), _VMEM_LIMIT_CAP))


# ------------------------- fused single-pass kernel --------------------------
def _fused_kernel(gamma_ref, x_ref, o_ref, matrix_ref, tailor_ref, *,
                  n_total, tn, use_bf16_mxu):
    # gamma_ref:  (1, 1)     f32 SMEM (scalar path)
    # x_ref:      (1, C, N)  in_dtype  -- whole per-batch slab, VMEM resident
    # o_ref:      (1, C, N)  in_dtype
    # matrix_ref: (C, C)     f32 scratch
    # tailor_ref: (C, 1)     f32 scratch
    matrix_ref[...] = jnp.zeros_like(matrix_ref)
    tailor_ref[...] = jnp.zeros_like(tailor_ref)

    nt_full = n_total // tn
    rem = n_total - nt_full * tn

    def _accumulate(x):                                   # x: (C, w) f32
        sumsq = jnp.sum(x * x, axis=0, keepdims=True)     # (1, w)
        qn = x * lax.rsqrt(sumsq)                         # (C, w)  (EUP rsqrt)
        if use_bf16_mxu:
            a, b = x.astype(jnp.bfloat16), qn.astype(jnp.bfloat16)
        else:
            a, b = x, qn
        # matrix[c, m] += sum_n x[c, n] * qn[m, n]  (MXU, f32 accumulation)
        matrix_ref[...] += lax.dot_general(
            a, b, (((1,), (1,)), ((), ())), preferred_element_type=jnp.float32)
        sum_q = jnp.sum(qn, axis=0, keepdims=True)        # (1, w)
        tailor_ref[...] += jnp.sum(qn * (sum_q + EPS), axis=1, keepdims=True)

    def reduce_body(t, carry):
        off = pl.multiple_of(t * tn, tn)
        _accumulate(x_ref[0, :, pl.ds(off, tn)].astype(jnp.float32))
        return carry

    if nt_full > 0:
        lax.fori_loop(0, nt_full, reduce_body, 0)
    if rem > 0:                                           # static tail chunk
        _accumulate(x_ref[0, :, nt_full * tn:].astype(jnp.float32))

    # Finalize: exact reciprocal, once per batch on a tiny (C, 1) vector.
    tailor_ref[...] = 1.0 / (jnp.float32(n_total) + tailor_ref[...])
    gamma = gamma_ref[0, 0]

    def _apply(x):                                        # x: (C, w) f32
        sumsq = jnp.sum(x * x, axis=0, keepdims=True)
        qn = x * lax.rsqrt(sumsq)
        value_sum = jnp.sum(x, axis=0, keepdims=True)     # (1, w)
        m = matrix_ref[...]
        if use_bf16_mxu:
            m, rhs = m.astype(jnp.bfloat16), qn.astype(jnp.bfloat16)
        else:
            rhs = qn
        part = jnp.dot(m, rhs, preferred_element_type=jnp.float32)   # (C, w)
        return x + gamma * ((value_sum + part) * tailor_ref[...])

    def apply_body(t, carry):
        off = pl.multiple_of(t * tn, tn)
        xt = x_ref[0, :, pl.ds(off, tn)].astype(jnp.float32)
        o_ref[0, :, pl.ds(off, tn)] = _apply(xt).astype(o_ref.dtype)
        return carry

    if nt_full > 0:
        lax.fori_loop(0, nt_full, apply_body, 0)
    if rem > 0:
        xt = x_ref[0, :, nt_full * tn:].astype(jnp.float32)
        o_ref[0, :, nt_full * tn:] = _apply(xt).astype(o_ref.dtype)


# ---------------------- two-pass fallback: phase 1 ---------------------------
def _reduce_kernel(x_ref, matrix_ref, tailor_ref, *, n_total, tn, use_bf16_mxu):
    # x_ref:      (1, C, tn) in_dtype streamed tile
    # matrix_ref: (1, C, C)  f32 resident accumulator
    # tailor_ref: (1, C, 1)  f32 resident accumulator -> finalized to 1/denom
    t = pl.program_id(1)
    nt = pl.num_programs(1)

    @pl.when(t == 0)
    def _init():
        matrix_ref[...] = jnp.zeros_like(matrix_ref)
        tailor_ref[...] = jnp.zeros_like(tailor_ref)

    x = x_ref[0].astype(jnp.float32)                       # (C, tn)
    if n_total % tn != 0:
        # Boundary block: mask padded (undefined) columns before the rsqrt so
        # they contribute exactly zero to both accumulators.
        col = t * tn + lax.broadcasted_iota(jnp.int32, (1, tn), 1)
        valid = col < n_total
        x = jnp.where(valid, x, 0.0)
        sumsq = jnp.where(valid, jnp.sum(x * x, axis=0, keepdims=True), 1.0)
    else:
        sumsq = jnp.sum(x * x, axis=0, keepdims=True)      # (1, tn)
    qn = x * lax.rsqrt(sumsq)                              # (C, tn)

    if use_bf16_mxu:
        a, b = x.astype(jnp.bfloat16), qn.astype(jnp.bfloat16)
    else:
        a, b = x, qn
    matrix_ref[0] += lax.dot_general(
        a, b, (((1,), (1,)), ((), ())), preferred_element_type=jnp.float32)

    sum_q = jnp.sum(qn, axis=0, keepdims=True)             # (1, tn)
    tailor_ref[0] += jnp.sum(qn * (sum_q + EPS), axis=1, keepdims=True)

    @pl.when(t == nt - 1)
    def _finalize():
        # Exact reciprocal (once per batch, (C, 1) vector).
        tailor_ref[0] = 1.0 / (jnp.float32(n_total) + tailor_ref[0])


# ---------------------- two-pass fallback: phase 2 ---------------------------
def _apply_kernel(gamma_ref, matrix_ref, tailor_ref, x_ref, o_ref, *,
                  n_total, tn, use_bf16_mxu):
    # gamma_ref:  (1, 1)     f32 SMEM
    # matrix_ref: (1, C, C)  f32
    # tailor_ref: (1, C, 1)  f32
    # x_ref/o_ref:(1, C, tn) in_dtype
    t = pl.program_id(1)
    x = x_ref[0].astype(jnp.float32)                       # (C, tn)
    if n_total % tn != 0:
        col = t * tn + lax.broadcasted_iota(jnp.int32, (1, tn), 1)
        valid = col < n_total
        x = jnp.where(valid, x, 0.0)
        sumsq = jnp.where(valid, jnp.sum(x * x, axis=0, keepdims=True), 1.0)
    else:
        sumsq = jnp.sum(x * x, axis=0, keepdims=True)
    qn = x * lax.rsqrt(sumsq)                              # (C, tn)
    value_sum = jnp.sum(x, axis=0, keepdims=True)          # (1, tn)

    m = matrix_ref[0]
    if use_bf16_mxu:
        m, rhs = m.astype(jnp.bfloat16), qn.astype(jnp.bfloat16)
    else:
        rhs = qn
    part = jnp.dot(m, rhs, preferred_element_type=jnp.float32)   # (C, tn)

    gamma = gamma_ref[0, 0]
    o_ref[0] = (x + gamma * ((value_sum + part) * tailor_ref[0])).astype(o_ref.dtype)


# --------------------------------- wrapper -----------------------------------
def channel_linear_attention(x, gamma, *, force_two_pass=False):
    """x: (B, C, H, W); gamma: broadcastable to a scalar.  Returns same shape/dtype as x."""
    B, C, H, W = x.shape
    N = H * W
    in_dtype = x.dtype
    itemsize = jnp.dtype(in_dtype).itemsize
    c_pad = _pad8(C)
    use_bf16_mxu = C >= 128            # compute-bound regime only

    x_flat = x.reshape(B, C, N)        # keep native dtype in HBM (no astype pass)
    gamma_s = jnp.asarray(gamma, jnp.float32).reshape(1, 1)

    tn = _pick_tile(N, C)

    # ---------------- fused single-pass path (bounded by VMEM gate) ---------
    fused_need = (4 * c_pad * N * itemsize                 # x + o blocks, 2x buffered
                  + 2 * c_pad * max(C, 128) * 4            # matrix + tailor scratch
                  + 8 * c_pad * tn * 4                     # per-tile f32 intermediates
                  + 2 * _MIB)                              # slack
    if not force_two_pass and fused_need <= _FUSED_VMEM_GATE:
        out_flat = pl.pallas_call(
            functools.partial(_fused_kernel, n_total=N, tn=tn,
                              use_bf16_mxu=use_bf16_mxu),
            out_shape=jax.ShapeDtypeStruct((B, C, N), in_dtype),
            grid_spec=pltpu.PrefetchScalarGridSpec(
                num_scalar_prefetch=0,
                grid=(B,),
                in_specs=[
                    pl.BlockSpec(memory_space=pltpu.MemorySpace.SMEM),  # gamma
                    pl.BlockSpec((1, C, N), lambda b: (b, 0, 0)),       # x slab
                ],
                out_specs=pl.BlockSpec((1, C, N), lambda b: (b, 0, 0)),
                scratch_shapes=[pltpu.VMEM((C, C), jnp.float32),
                                pltpu.VMEM((C, 1), jnp.float32)],
            ),
            compiler_params=pltpu.CompilerParams(
                dimension_semantics=("parallel",),
                vmem_limit_bytes=_vmem_limit(fused_need)),
        )(gamma_s, x_flat)
        return out_flat.reshape(B, C, H, W)

    # ---------------- two-pass fallback (large C*N): bounded VMEM -----------
    nt = int(pl.cdiv(N, tn))
    p1_need = (2 * c_pad * tn * itemsize + 2 * c_pad * max(C, 128) * 4
               + 4 * c_pad * tn * 4 + 2 * _MIB)
    p2_need = (4 * c_pad * tn * itemsize + 2 * c_pad * max(C, 128) * 4
               + 6 * c_pad * tn * 4 + 2 * _MIB)
    vlim = _vmem_limit(max(p1_need, p2_need))

    matrix, tailor = pl.pallas_call(
        functools.partial(_reduce_kernel, n_total=N, tn=tn,
                          use_bf16_mxu=use_bf16_mxu),
        out_shape=(jax.ShapeDtypeStruct((B, C, C), jnp.float32),
                   jax.ShapeDtypeStruct((B, C, 1), jnp.float32)),
        grid_spec=pltpu.PrefetchScalarGridSpec(
            num_scalar_prefetch=0,
            grid=(B, nt),
            in_specs=[pl.BlockSpec((1, C, tn), lambda b, t: (b, 0, t))],
            out_specs=[pl.BlockSpec((1, C, C), lambda b, t: (b, 0, 0)),
                       pl.BlockSpec((1, C, 1), lambda b, t: (b, 0, 0))],
        ),
        compiler_params=pltpu.CompilerParams(
            dimension_semantics=("parallel", "arbitrary"),
            vmem_limit_bytes=vlim),
    )(x_flat)

    out_flat = pl.pallas_call(
        functools.partial(_apply_kernel, n_total=N, tn=tn,
                          use_bf16_mxu=use_bf16_mxu),
        out_shape=jax.ShapeDtypeStruct((B, C, N), in_dtype),
        grid_spec=pltpu.PrefetchScalarGridSpec(
            num_scalar_prefetch=0,
            grid=(B, nt),
            in_specs=[
                pl.BlockSpec(memory_space=pltpu.MemorySpace.SMEM),   # gamma
                pl.BlockSpec((1, C, C), lambda b, t: (b, 0, 0)),     # matrix
                pl.BlockSpec((1, C, 1), lambda b, t: (b, 0, 0)),     # tailor
                pl.BlockSpec((1, C, tn), lambda b, t: (b, 0, t)),    # x tile
            ],
            out_specs=pl.BlockSpec((1, C, tn), lambda b, t: (b, 0, t)),
        ),
        compiler_params=pltpu.CompilerParams(
            dimension_semantics=("parallel", "parallel"),
            vmem_limit_bytes=vlim),
    )(gamma_s, matrix, tailor, x_flat)

    # torch does weight_value.view(B, C, height, width); spatial dims are
    # square in this module's usage so this is the same contiguous reshape.
    return out_flat.reshape(B, C, H, W)


# -------------------------------- reference ----------------------------------
def _reference(x, gamma, eps=EPS):
    # Pure-JAX transliteration of the PyTorch forward, for validation.
    B, C, H, W = x.shape
    N = H * W
    xf = x.reshape(B, C, N).astype(jnp.float32)
    norm = jnp.sqrt(jnp.sum(xf * xf, axis=1, keepdims=True))          # (B,1,N)
    Q = xf / norm                                                     # (B,C,N)
    sumQ = jnp.sum(Q, axis=1)                                         # (B,N)
    tailor = 1.0 / (N + jnp.einsum('bcn,bn->bc', Q, sumQ + eps))      # (B,C)
    value_sum = jnp.sum(xf, axis=1, keepdims=True)                    # (B,1,N)
    matrix = jnp.einsum('bcn,bmn->bcm', xf, Q)                        # (B,C,C)
    part = jnp.einsum('bcm,bmn->bcn', matrix, Q)                      # (B,C,N)
    wv = (value_sum + part) * tailor[:, :, None]
    return (xf + jnp.asarray(gamma, jnp.float32).reshape(()) * wv).reshape(B, C, H, W)


if __name__ == "__main__":
    key = jax.random.PRNGKey(0)
    B, C, H, W = 2, 4, 16, 16
    x = jax.random.normal(key, (B, C, H, W), dtype=jnp.float32)

    # Parameter per the module's __init__: gamma = zeros(1)
    gamma = jnp.zeros((1,), dtype=jnp.float32)
    out = channel_linear_attention(x, gamma)                 # fused path
    jax.block_until_ready(out)
    assert jnp.allclose(out, _reference(x, gamma), atol=1e-5, rtol=1e-5)

    # Nonzero gamma exercises the full attention path (exact reciprocal now).
    gamma_nz = jnp.full((1,), 0.5, dtype=jnp.float32)
    out_nz = channel_linear_attention(x, gamma_nz)           # fused path
    jax.block_until_ready(out_nz)
    ref_nz = _reference(x, gamma_nz)
    assert jnp.allclose(out_nz, ref_nz, atol=1e-4, rtol=1e-4)

    # Exercise the two-pass fallback on the same shape.
    out_tp = channel_linear_attention(x, gamma_nz, force_two_pass=True)
    jax.block_until_ready(out_tp)
    assert jnp.allclose(out_tp, ref_nz, atol=1e-4, rtol=1e-4)

    # Non-128-divisible N: fused remainder chunk + masked two-pass boundary tile.
    x_odd = jax.random.normal(jax.random.PRNGKey(1), (1, 4, 15, 15), dtype=jnp.float32)
    ref_odd = _reference(x_odd, gamma_nz)
    out_odd_fused = channel_linear_attention(x_odd, gamma_nz)
    jax.block_until_ready(out_odd_fused)
    assert jnp.allclose(out_odd_fused, ref_odd, atol=1e-4, rtol=1e-4)
    out_odd_tp = channel_linear_attention(x_odd, gamma_nz, force_two_pass=True)
    jax.block_until_ready(out_odd_tp)
    assert jnp.allclose(out_odd_tp, ref_odd, atol=1e-4, rtol=1e-4)

    print("KERNEL_OK")
</pallas_src>

<mosaic_0001>
module attributes {stable_mosaic.version = 11 : i64} {
  func.func @_fused_kernel(%arg0: i32, %arg1: memref<1x1xf32, #tpu.memory_space<smem>>, %arg2: memref<1x4x256xf32, #tpu.memory_space<vmem>>, %arg3: memref<1x4x256xf32, #tpu.memory_space<vmem>>, %arg4: memref<4x4xf32, #tpu.memory_space<vmem>>, %arg5: memref<4x1xf32, #tpu.memory_space<vmem>>) attributes {dimension_semantics = [#tpu.dimension_semantics<parallel>], iteration_bounds = array<i64: 2>, scalar_prefetch = 0 : i64, scratch_operands = 2 : i64, tpu.core_type = #tpu.core_type<tc>, window_params = [{transform_indices = @transform_0, window_bounds = array<i64: 1, 1>}, {transform_indices = @transform_1, window_bounds = array<i64: 1, 4, 256>}, {transform_indices = @transform_2, window_bounds = array<i64: 1, 4, 256>}]} {
    %cst = arith.constant 0.000000e+00 : f32
    %0 = vector.broadcast %cst : f32 to vector<4x4xf32>
    %c0 = arith.constant 0 : index
    %c0_0 = arith.constant 0 : index
    %1 = vector.load %arg4[%c0, %c0_0] : memref<4x4xf32, #tpu.memory_space<vmem>>, vector<4x4xf32>
    tpu.vector_store %arg4[%c0, %c0_0], %0 {strides = array<i32>} : memref<4x4xf32, #tpu.memory_space<vmem>>, vector<4x4xf32>,
    %cst_1 = arith.constant 0.000000e+00 : f32
    %2 = vector.broadcast %cst_1 : f32 to vector<4x1xf32>
    %c0_2 = arith.constant 0 : index
    %c0_3 = arith.constant 0 : index
    %3 = vector.load %arg5[%c0_2, %c0_3] : memref<4x1xf32, #tpu.memory_space<vmem>>, vector<4x1xf32>
    tpu.vector_store %arg5[%c0_2, %c0_3], %2 {strides = array<i32>} : memref<4x1xf32, #tpu.memory_space<vmem>>, vector<4x1xf32>,
    %c0_i32 = arith.constant 0 : i32
    %c256_i32 = arith.constant 256 : i32
    %4 = arith.muli %c0_i32, %c256_i32 : i32
    %5 = tpu.assume_multiple %4, 256 : i32
    %c0_4 = arith.constant 0 : index
    %c0_5 = arith.constant 0 : index
    %6 = arith.index_cast %5 : i32 to index
    %7 = vector.load %arg2[%c0_4, %c0_5, %6] : memref<1x4x256xf32, #tpu.memory_space<vmem>>, vector<1x4x256xf32>
    %8 = vector.shape_cast %7 : vector<1x4x256xf32> to vector<4x256xf32>
    %9 = arith.mulf %8, %8 : vector<4x256xf32>
    %cst_6 = arith.constant dense<0.000000e+00> : vector<256xf32>
    %10 = vector.multi_reduction <add>, %9, %cst_6 [0] : vector<4x256xf32> to vector<256xf32>
    %11 = vector.shape_cast %10 : vector<256xf32> to vector<1x256xf32>
    %12 = math.rsqrt %11 : vector<1x256xf32>
    %13 = vector.broadcast %12 : vector<1x256xf32> to vector<4x256xf32>
    %14 = arith.mulf %8, %13 : vector<4x256xf32>
    %c0_7 = arith.constant 0 : index
    %c0_8 = arith.constant 0 : index
    %15 = vector.load %arg4[%c0_7, %c0_8] : memref<4x4xf32, #tpu.memory_space<vmem>>, vector<4x4xf32>
    %cst_9 = arith.constant dense<0.000000e+00> : vector<4x4xf32>
    %16 = tpu.matmul %8, %14, %cst_9 {dimension_numbers = #tpu.dot_dimension_numbers<[1], [1], [0], [0], [0, 0, 1, 0], [], []>} : vector<4x256xf32>, vector<4x256xf32>, vector<4x4xf32> -> vector<4x4xf32>
    %17 = arith.addf %15, %16 : vector<4x4xf32>
    %c0_10 = arith.constant 0 : index
    %c0_11 = arith.constant 0 : index
    %18 = vector.load %arg4[%c0_10, %c0_11] : memref<4x4xf32, #tpu.memory_space<vmem>>, vector<4x4xf32>
    tpu.vector_store %arg4[%c0_10, %c0_11], %17 {strides = array<i32>} : memref<4x4xf32, #tpu.memory_space<vmem>>, vector<4x4xf32>,
    %cst_12 = arith.constant dense<0.000000e+00> : vector<256xf32>
    %19 = vector.multi_reduction <add>, %14, %cst_12 [0] : vector<4x256xf32> to vector<256xf32>
    %20 = vector.shape_cast %19 : vector<256xf32> to vector<1x256xf32>
    %c0_13 = arith.constant 0 : index
    %c0_14 = arith.constant 0 : index
    %21 = vector.load %arg5[%c0_13, %c0_14] : memref<4x1xf32, #tpu.memory_space<vmem>>, vector<4x1xf32>
    %cst_15 = arith.constant 9.99999997E-7 : f32
    %22 = vector.broadcast %cst_15 : f32 to vector<1x256xf32>
    %23 = arith.addf %20, %22 : vector<1x256xf32>
    %24 = vector.broadcast %23 : vector<1x256xf32> to vector<4x256xf32>
    %25 = arith.mulf %14, %24 : vector<4x256xf32>
    %cst_16 = arith.constant dense<0.000000e+00> : vector<4xf32>
    %26 = vector.multi_reduction <add>, %25, %cst_16 [1] : vector<4x256xf32> to vector<4xf32>
    %27 = vector.shape_cast %26 : vector<4xf32> to vector<4x1xf32>
    %28 = arith.addf %21, %27 : vector<4x1xf32>
    %c0_17 = arith.constant 0 : index
    %c0_18 = arith.constant 0 : index
    %29 = vector.load %arg5[%c0_17, %c0_18] : memref<4x1xf32, #tpu.memory_space<vmem>>, vector<4x1xf32>
    tpu.vector_store %arg5[%c0_17, %c0_18], %28 {strides = array<i32>} : memref<4x1xf32, #tpu.memory_space<vmem>>, vector<4x1xf32>,
    %c1_i32 = arith.constant 1 : i32
    %c0_19 = arith.constant 0 : index
    %c0_20 = arith.constant 0 : index
    %30 = vector.load %arg5[%c0_19, %c0_20] : memref<4x1xf32, #tpu.memory_space<vmem>>, vector<4x1xf32>
    %cst_21 = arith.constant 2.560000e+02 : f32
    %31 = vector.broadcast %cst_21 : f32 to vector<4x1xf32>
    %32 = arith.addf %31, %30 : vector<4x1xf32>
    %cst_22 = arith.constant 1.000000e+00 : f32
    %33 = vector.broadcast %cst_22 : f32 to vector<4x1xf32>
    %34 = arith.divf %33, %32 : vector<4x1xf32>
    %c0_23 = arith.constant 0 : index
    %c0_24 = arith.constant 0 : index
    %35 = vector.load %arg5[%c0_23, %c0_24] : memref<4x1xf32, #tpu.memory_space<vmem>>, vector<4x1xf32>
    tpu.vector_store %arg5[%c0_23, %c0_24], %34 {strides = array<i32>} : memref<4x1xf32, #tpu.memory_space<vmem>>, vector<4x1xf32>,
    %c0_25 = arith.constant 0 : index
    %c0_26 = arith.constant 0 : index
    %36 = memref.load %arg1[%c0_25, %c0_26] : memref<1x1xf32, #tpu.memory_space<smem>>
    %c0_i32_27 = arith.constant 0 : i32
    %c256_i32_28 = arith.constant 256 : i32
    %37 = arith.muli %c0_i32_27, %c256_i32_28 : i32
    %38 = tpu.assume_multiple %37, 256 : i32
    %c0_29 = arith.constant 0 : index
    %c0_30 = arith.constant 0 : index
    %39 = arith.index_cast %38 : i32 to index
    %40 = vector.load %arg2[%c0_29, %c0_30, %39] : memref<1x4x256xf32, #tpu.memory_space<vmem>>, vector<1x4x256xf32>
    %41 = vector.shape_cast %40 : vector<1x4x256xf32> to vector<4x256xf32>
    %42 = arith.mulf %41, %41 : vector<4x256xf32>
    %cst_31 = arith.constant dense<0.000000e+00> : vector<256xf32>
    %43 = vector.multi_reduction <add>, %42, %cst_31 [0] : vector<4x256xf32> to vector<256xf32>
    %44 = vector.shape_cast %43 : vector<256xf32> to vector<1x256xf32>
    %45 = math.rsqrt %44 : vector<1x256xf32>
    %46 = vector.broadcast %45 : vector<1x256xf32> to vector<4x256xf32>
    %47 = arith.mulf %41, %46 : vector<4x256xf32>
    %cst_32 = arith.constant dense<0.000000e+00> : vector<256xf32>
    %48 = vector.multi_reduction <add>, %41, %cst_32 [0] : vector<4x256xf32> to vector<256xf32>
    %49 = vector.shape_cast %48 : vector<256xf32> to vector<1x256xf32>
    %c0_33 = arith.constant 0 : index
    %c0_34 = arith.constant 0 : index
    %50 = vector.load %arg4[%c0_33, %c0_34] : memref<4x4xf32, #tpu.memory_space<vmem>>, vector<4x4xf32>
    %cst_35 = arith.constant dense<0.000000e+00> : vector<4x256xf32>
    %51 = tpu.matmul %50, %47, %cst_35 {dimension_numbers = #tpu.dot_dimension_numbers<[1], [0], [0], [1], [0, 0, 1, 1], [], []>} : vector<4x4xf32>, vector<4x256xf32>, vector<4x256xf32> -> vector<4x256xf32>
    %52 = vector.broadcast %49 : vector<1x256xf32> to vector<4x256xf32>
    %53 = arith.addf %52, %51 : vector<4x256xf32>
    %c0_36 = arith.constant 0 : index
    %c0_37 = arith.constant 0 : index
    %54 = vector.load %arg5[%c0_36, %c0_37] : memref<4x1xf32, #tpu.memory_space<vmem>>, vector<4x1xf32>
    %55 = vector.broadcast %54 : vector<4x1xf32> to vector<4x256xf32>
    %56 = arith.mulf %53, %55 : vector<4x256xf32>
    %57 = vector.broadcast %36 : f32 to vector<4x256xf32>
    %58 = arith.mulf %57, %56 : vector<4x256xf32>
    %59 = arith.addf %41, %58 : vector<4x256xf32>
    %c0_38 = arith.constant 0 : index
    %c0_39 = arith.constant 0 : index
    %60 = arith.index_cast %38 : i32 to index
    %61 = vector.load %arg3[%c0_38, %c0_39, %60] : memref<1x4x256xf32, #tpu.memory_space<vmem>>, vector<1x4x256xf32>
    %62 = vector.shape_cast %61 : vector<1x4x256xf32> to vector<4x256xf32>
    %63 = vector.shape_cast %59 : vector<4x256xf32> to vector<1x4x256xf32>
    tpu.vector_store %arg3[%c0_38, %c0_39, %60], %63 {strides = array<i32>} : memref<1x4x256xf32, #tpu.memory_space<vmem>>, vector<1x4x256xf32>,
    %c1_i32_40 = arith.constant 1 : i32
    return
  }
  func.func @transform_0(%arg0: i32) -> (i32, i32) {
    %c0_i32 = arith.constant 0 : i32
    %c0_i32_0 = arith.constant 0 : i32
    %c0_i32_1 = arith.constant 0 : i32
    return %c0_i32, %c0_i32_0 : i32, i32
  }
  func.func @transform_1(%arg0: i32) -> (i32, i32, i32) {
    %c0_i32 = arith.constant 0 : i32
    %c0_i32_0 = arith.constant 0 : i32
    %c0_i32_1 = arith.constant 0 : i32
    return %arg0, %c0_i32, %c0_i32_0 : i32, i32, i32
  }
  func.func @transform_2(%arg0: i32) -> (i32, i32, i32) {
    %c0_i32 = arith.constant 0 : i32
    %c0_i32_0 = arith.constant 0 : i32
    %c0_i32_1 = arith.constant 0 : i32
    return %arg0, %c0_i32, %c0_i32_0 : i32, i32, i32
  }
}

</mosaic_0001>

<bundles_post_ra>
// kernel: tpu_custom_call.1
= control target key start
LH: loop header
LB: loop body
LE: loop exit
PB: predicated region body
PF: predicated region fallthrough
CT: control target
= control target key end

     0   :  { %s900_s0 = inlined_call_operand.<no memory space> [shape: f32[1,1], index: 0, kind: input, shape index: {}]   ;;  %s901_s1 = inlined_call_operand.hbm [shape: f32[2,4,256], index: 1, kind: input, shape index: {}]   ;;  %s902_s2 = inlined_call_operand.hbm [shape: f32[2,4,256], index: 2, kind: output, shape index: {}]  }
   0x1   :  { %7 = sst [smem:[#allocation4]] %s900_s0 }
   0x2   :  { %8 = vsyncpa [#allocation6], 0 }
   0x3   :  { %10 = vsyncpa [#allocation6 + $0x1], 0 }
   0x4   :  { %11 = vsyncpa [#allocation7], 0 }
   0x5   :  { %13 = vsyncpa [#allocation7 + $0x1], 0  ;;  %s729_s11 = smov 0   ;;  %s731_s12 = smov 0  }
   0x6   :  { %s733_s13 = smov 0   ;;  %s735_s14 = smov 0  }
   0x7 LB: > { %s750_s0 = sadd.s32 4294967295, %s705_s14   ;;  %s538_s15 = sadd.s32 4294967294, %s705_s14   ;;  %s705_s14 = sphi %s735_s14, %s919_s14   ;;  %s701_s13 = sphi %s733_s13, %s918_s13   ;;  %s697_s12 = sphi %s731_s12, %s917_s12   ;;  %s693_s11 = sphi %s729_s11, %s916_s11  }
   0x8   : > { %s754_s16 = sadd.s32 1, %s705_s14   ;;  %s47_s17 = sadd.s32 1, %s701_s13 }
   0x9   : > { %s44_s18 = ssub.s32 %s705_s14, %s754_s16  ;;  %p54_p0 = scmp.ne.s32.totalorder %s701_s13, %s697_s12 }
   0xa   : > { %p45_p1 = scmp.eq.s32.totalorder %s44_s18, 0  ;;  %p55_p2 = scmp.eq.s32.totalorder %s705_s14, 0 }
   0xb   : > { %p60_p3 = scmp.ne.s32.totalorder %s697_s12, %s693_s11  ;;  %p61_p4 = scmp.eq.s32.totalorder %s750_s0, 0 }
   0xc   : > { %s766_s19 = scalar_select %p45_p1, %s701_s13, %s47_s17  }
   0xd   : > { %p768_p5 = por %p55_p2, %p54_p0  ;;  %p772_p6 = por %p61_p4, %p60_p3 }
   0xe   : > { %p84_p7 = scmp.eq.s32.totalorder %s750_s0, 1  ;;  %p90_p8 = scmp.eq.s32.totalorder %s538_s15, 1 }
   0xf   : > { %s906_s21 = scalar_select %p772_p6, 1, 0 }
  0x10   : > { %p569_p10 = scmp.lt.s32.totalorder %s705_s14, 2  ;;  %p779_p11 = por %p84_p7, %p54_p0 }
  0x11   : > { %p783_p12 = por %p90_p8, %p60_p3  ;;  %s113_s24 = sand.u32 1, %s701_s13  }
  0x12   : > { %s907_s22 = scalar_select %p779_p11, 1, 0 }
  0x13   : > { %s908_s23 = scalar_select %p783_p12, 1, 0 }
  0x14   : > { %s555_s25 = sshll.u32 %s705_s14, 7  ;;  %s541_s26 = sshll.u32 %s113_s24, 3 }
  0x15   : > { %s792_s29 = scalar_lea.hbm %s901_s1, %s555_s25  ;;  %s117_s30 = scalar_lea.vmem [#allocation5], %s541_s26 }
  0x16   : > { %s125_s3 = sshll.u32 %s117_s30, 4  ;;  %p796_p13 = pnand %p569_p10, %p768_p5  ;;  %s800_s3 = int_to_ptr.vmem [resolvable:$true] %s125_s3 }
  0x17   : > { %s114_s5 = scalar_lea.sflag [#allocation6], %s113_s24  ;;  %s613_s6 = scalar_lea.hbm %s792_s29, 128 }
  0x18   : > { %p614_p2 = scmp.ne.s32.totalorder %s792_s29, %s613_s6  ;;  %p615_p3 = pneg %p796_p13 }
  0x19   : > { %s618_s9 = scalar_lea.hbm %s901_s1, 256  ;;  %p619_p5 = scmp.lt.s32.totalorder %s792_s29, %s901_s1 }
  0x1a   : > { %p616_p4 = pnand %p615_p3, %p614_p2  ;;  %p620_p8 = scmp.lt.s32.totalorder %s618_s9, %s613_s6 }
  0x1c   : > { %p617_p7 = pneg %p616_p4  ;;  %p621_p10 = por %p620_p8, %p619_p5 }
  0x1e   : > { %p622_p9 = pnand %p621_p10, %p617_p7 }
  0x20   : > { %625 = shalt.err (!%p622_p9)
}
  0x21   : > { %s626_s17 = scalar_lea.vmem %s800_s3, 128  ;;  %s707_s18 = smov [#allocation5]  }
  0x22   : > { %p627_p0 = scmp.ne.s32.totalorder %s800_s3, %s626_s17  ;;  %s631_s20 = sshll.u32 %s707_s18, 4  ;;  %s632_s20 = int_to_ptr.vmem [resolvable:$false] %s631_s20 }
  0x23   : > { %s633_s24 = scalar_lea.vmem %s632_s20, 256  ;;  %p634_p4 = scmp.lt.s32.totalorder %s800_s3, %s632_s20 }
  0x24   : > { %p629_p1 = pnand %p627_p0, %p615_p3  ;;  %p635_p12 = scmp.lt.s32.totalorder %s633_s24, %s626_s17 }
  0x26   : > { %p630_p2 = pneg %p629_p1  ;;  %p636_p11 = por %p635_p12, %p634_p4 }
  0x28   : > { %p637_p6 = pnand %p636_p11, %p630_p2 }
  0x2a   : > { %640 = shalt.err (!%p637_p6)
}
  0x2b   : > { %564 = dma.hbm_to_vmem [thread:$0]  (!%p796_p13), %s792_s29, 128, %s800_s3, %s114_s5  }
  0x2c   : > { %p910_p9 = scmp.lt.s32.totalorder %s705_s14, 3  ;;  %p911_p7 = scmp.ge.s32.totalorder %s705_s14, 1 }
  0x2e   : > { %p131_p0 = pnand %p911_p7, %p910_p9 }
  0x2f   : > { %s827_s25 = sand.u32 (!%p131_p0), 1, %s697_s12   ;;  %p912_p6 = scmp.ne.s32.totalorder (!%p131_p0), %s906_s21, 0 }
  0x30   : > { %134 = sbr.rel (%p131_p0) target bundleno = 517 (0x205), region = 28  ;;  %s545_s26 = sshll.u32 (!%p131_p0), %s827_s25, 3 }
  0x31   : > { %s137_s27 = scalar_lea.sflag (!%p131_p0), [#allocation6], %s827_s25  ;;  %s140_s28 = scalar_lea.vmem (!%p131_p0), [#allocation5], %s545_s26 }
  0x35   : > { %684 = dma.done.wait (%p912_p6), %s137_s27, 128  }
  0x36   : > { %686 = vsyncadd (%p912_p6), %s137_s27, 4294967168  ;;  %vm161_vm0 = vcmask 27648   ;;  %v708_v0 = vmov 0.0   ;;  %v838_v1 = vld [vmem:[%s140_s28] sm:$0xff]  ;;  %vm170_vm1 = vcmask 1043456   ;;  %vm163_vm2 = vcmask 3072  }
  0x37   : > { %162 = vst.msk [vmem:[#allocation2] sm:$0xf] %vm161_vm0, %v708_v0  ;;  %427 = vmatprep.mubr.f32.mxu1 %v708_v0  ;;  %v166_v2 = vmul.f32 %v838_v1, %v838_v1  ;;  %v844_v3 = vcombine.high %v838_v1, %v838_v1  ;;  %v709_v46 = vmov 0   ;;  %vm355_vm3 = vcmask 31744   ;;  %s308_s21 = sld [smem:[#allocation4]]  ;;  %s556_s29 = sshll.u32 %s750_s0, 7 }
  0x38   : > { %164 = vst.msk [vmem:[#allocation3] sm:$0xf] %vm163_vm2, %v708_v0  ;;  %605 = vset.pattern.permute.xlu0 %v709_v46  ;;  %v338_v59 = vsel %vm170_vm1, %v838_v1, 0.0  ;;  %s160_s30 = scalar_lea.vmem [#allocation8], %s545_s26  ;;  %s466_s6 = scalar_lea.hbm %s902_s2, %s556_s29 }
  0x39   : > { %v168_v4 = vcombine.high %v166_v2, %v166_v2  ;;  %v171_v5 = vsel %vm170_vm1, %v166_v2, 0.0  ;;  %263 = vmatprep.mubr.f32.mxu0 %v844_v3  ;;  %v345_v60 = vsel %vm170_vm1, %v844_v3, 0.0  ;;  %v339_v61 = vrot.slane %v338_v59, 4  ;;  %s468_s3 = sshll.u32 %s160_s30, 4  ;;  %s454_s7 = scalar_lea.sflag [#allocation7], %s827_s25  ;;  %s469_s3 = int_to_ptr.vmem [resolvable:$true] %s468_s3 }
  0x3a   : > { %v172_v6 = vrot.slane %v171_v5, 4  ;;  %v346_v62 = vrot.slane %v345_v60, 4  ;;  %s641_s8 = scalar_lea.vmem %s469_s3, 128  ;;  %p913_p12 = scmp.ne.s32.totalorder %s907_s22, 0 }
  0x3b   : > { %v178_v7 = vsel %vm170_vm1, %v168_v4, 0.0  ;;  %v340_v63 = vadd.f32 %v339_v61, %v338_v59  ;;  %p642_p11 = scmp.ne.s32.totalorder %s469_s3, %s641_s8  ;;  %s710_s9 = smov [#allocation8]  }
  0x3c   : > { %v173_v8 = vadd.f32 %v172_v6, %v171_v5  ;;  %v179_v9 = vrot.slane %v178_v7, 4  ;;  %v347_v0 = vadd.f32 %v346_v62, %v345_v60  ;;  %s645_s0 = sshll.u32 %s710_s9, 4  ;;  %s646_s0 = int_to_ptr.vmem [resolvable:$false] %s645_s0 }
  0x3d   : > { %v341_v2 = vrot.slane %v340_v63, 2  ;;  %p643_p13 = pnand %p642_p11, %p913_p12  ;;  %s647_s10 = scalar_lea.vmem %s646_s0, 256 }
  0x3e   : > { %v174_v10 = vrot.slane %v173_v8, 2  ;;  %v180_v11 = vadd.f32 %v179_v9, %v178_v7  ;;  %v192_v53 = vld [vmem:[#allocation2] sm:$0xf]  ;;  %v348_v4 = vrot.slane %v347_v0, 2  ;;  %p648_p3 = scmp.lt.s32.totalorder %s469_s3, %s646_s0  ;;  %p649_p5 = scmp.lt.s32.totalorder %s647_s10, %s641_s8 }
  0x3f   : > { %v285_v47 = vld [vmem:[#allocation3] sm:$0xf]  ;;  %v342_v5 = vadd.f32 %v341_v2, %v340_v63  ;;  %p644_p1 = pneg %p643_p13 }
  0x40   : > { %v175_v12 = vadd.f32 %v174_v10, %v173_v8  ;;  %v181_v13 = vrot.slane %v180_v11, 2  ;;  %v349_v6 = vadd.f32 %v348_v4, %v347_v0  ;;  %p650_p8 = por %p649_p5, %p648_p3 }
  0x41   : > { %v343_v7 = vrot.slane %v342_v5, 1 }
  0x42   : > { %v176_v14 = vrot.slane %v175_v12, 1  ;;  %v182_v15 = vadd.f32 %v181_v13, %v180_v11  ;;  %v350_v8 = vrot.slane %v349_v6, 1  ;;  %p651_p10 = pnand %p650_p8, %p644_p1 }
  0x43   : > { %v344_v9 = vadd.f32 %v343_v7, %v342_v5 }
  0x44   : > { %v177_v16 = vadd.f32 %v176_v14, %v175_v12  ;;  %v183_v17 = vrot.slane %v182_v15, 1  ;;  %v351_v10 = vadd.f32 %v350_v8, %v349_v6 }
  0x46   : > { %v184_v18 = vadd.f32 %v183_v17, %v182_v15  ;;  %607 = vrsqrt.f32 %v177_v16  ;;  %v444_v16 = vstv %s308_s21 }
  0x48   : > { %609 = vrsqrt.f32 %v184_v18 }
  0x53   : > { %v608_v19 = vpop.eup %607 }
  0x55   : > { %v610_v20 = vpop.eup %609 }
  0x56   : > { %v189_v21 = vcombine.low %v608_v19, %v610_v20 }
  0x58   : > { %v191_v22 = vmul.f32 %v189_v21, %v838_v1 }
  0x5a   : > { %v197_v23 = vcombine.high %v191_v22, %v191_v22  ;;  %v271_v24 = vsel %vm170_vm1, %v191_v22, 0.0 }
  0x5b   : > { %v272_v25 = vrot.slane %v271_v24, 4 }
  0x5c   : > { %229 = vmatprep.subr.mxu0 %v197_v23  ;;  %v278_v26 = vsel %vm170_vm1, %v197_v23, 0.0  ;;  %547 = vmatprep.subr.msk.mxu1 %vm170_vm1, %v197_v23 }
  0x5d   : > { %v279_v27 = vrot.slane %v278_v26, 4  ;;  %230 = vmatpush1.xpose.msra.mxu0 %v191_v22  ;;  %v273_v28 = vadd.f32 %v272_v25, %v271_v24  ;;  %548 = vmatpush1.msk.msra.mxu1 %vm170_vm1, %v191_v22 }
  0x5f   : > { %v280_v29 = vadd.f32 %v279_v27, %v278_v26  ;;  %v274_v30 = vrot.slane %v273_v28, 2 }
  0x60   : > { %264 = vmatmul.mubr.f32.vlgmr.msra.gmra.mxu0 %v838_v1 }
  0x61   : > { %v281_v31 = vrot.slane %v280_v29, 2  ;;  %v275_v32 = vadd.f32 %v274_v30, %v273_v28 }
  0x63   : > { %v282_v33 = vadd.f32 %v281_v31, %v280_v29  ;;  %v276_v34 = vrot.slane %v275_v32, 1 }
  0x65   : > { %v283_v35 = vrot.slane %v282_v33, 1  ;;  %v277_v36 = vadd.f32 %v276_v34, %v275_v32 }
  0x67   : > { %v284_v37 = vadd.f32 %v283_v35, %v282_v33  ;;  %v286_v38 = vadd.f32 1e-06, %v277_v36 }
  0x69   : > { %v287_v39 = vadd.f32 1e-06, %v284_v37 }
  0x6b   : > { %v290_v40 = vcombine.low %v286_v38, %v287_v39 }
  0x6d   : > { %v292_v41 = vmul.f32 %v290_v40, %v191_v22 }
  0x6f   : > { %v294_v42 = vcombine.high %v292_v41, %v292_v41  ;;  %v296_v43 = vsel %vm170_vm1, %v292_v41, 0.0 }
  0x71   : > { %v297_v44 = vsel %vm170_vm1, %v294_v42, 0.0 }
  0x72   : > { %v298_v45 = vadd.f32 %v297_v44, %v296_v43 }
  0x74   : > { %299 = vadd.xlane.f32.xlu0 %v298_v45 }
  0xfd   : > { %v300_v48 = vpop.xlane.xlu0 %299 }
  0xfe   : > { %v301_v49 = vadd.f32 %v300_v48, %v285_v47 }
 0x100   : > { %302 = vst.msk [vmem:[#allocation3] sm:$0xf] %vm163_vm2, %v301_v49 }
 0x107   : > { %v303_v50 = vld [vmem:[#allocation3] sm:$0xf] }
 0x108   : > { %v304_v51 = vadd.f32 256.0, %v303_v50 }
 0x10a   : > { %611 = vrcp.f32 %v304_v51 }
 0x117   : > { %v612_v52 = vpop.eup %611 }
 0x118   : > { %307 = vst.msk [vmem:[#allocation3] sm:$0xf] %vm163_vm2, %v612_v52 }
 0x11f   : > { %v436_v54 = vld [vmem:[#allocation3] sm:$0xf] }
 0x120   : > { %v265_v55 = vpop.f32.mrf.mxu0  ;;  %439 = vperm.xlu0 %605, %v436_v54  }
 0x121   : > { %v269_v56 = vadd.f32 %v265_v55, %v192_v53 }
 0x122   : > { %v267_v57 = vpop.f32.mrf.mxu0 }
 0x123   : > { %270 = vst.msk [vmem:[#allocation2] sm:$0xf] %vm161_vm0, %v269_v56 }
 0x12a   : > { %v352_v58 = vld [vmem:[#allocation2] sm:$0xf] }
 0x12b   : > { %549 = vmatmul.mubr.msk.f32.vlgmr.msra.gmra.mxu1 %vm355_vm3, %v352_v58 }
 0x19b   : > { %v440_v12 = vpop.permute.xlu0 %439 }
 0x1eb   : > { %v429_v11 = vpop.f32.mrf.mxu1 }
 0x1ec   : > { %v434_v13 = vadd.f32 %v429_v11, %v344_v9 }
 0x1ed   : > { %v431_v3 = vpop.f32.mrf.mxu1 }
 0x1ee   : > { %v442_v14 = vmul.f32 %v440_v12, %v434_v13  ;;  %v435_v15 = vadd.f32 %v431_v3, %v351_v10 }
 0x1f0   : > { %v443_v17 = vmul.f32 %v440_v12, %v435_v15  ;;  %v445_v18 = vmul.f32 %v444_v16, %v442_v14 }
 0x1f2   : > { %v446_v19 = vmul.f32 %v444_v16, %v443_v17 }
 0x1f4   : > { %v449_v20 = vcombine.low %v445_v18, %v446_v19 }
 0x1f6   : > { %v451_v21 = vadd.f32 %v449_v20, %v838_v1 }
 0x1f8   : > { %452 = vst [vmem:[%s160_s30] sm:$0xff] %v451_v21 }
 0x1f9   : > { %654 = shalt.err (!%p651_p10)
}
 0x1fa   : > { %s655_s15 = scalar_lea.hbm %s466_s6, 128  ;;  %s659_s20 = scalar_lea.hbm %s902_s2, 256 }
 0x1fb   : > { %p656_p2 = scmp.ne.s32.totalorder %s466_s6, %s655_s15  ;;  %p660_p7 = scmp.lt.s32.totalorder %s466_s6, %s902_s2 }
 0x1fc   : > { %p661_p0 = scmp.lt.s32.totalorder %s659_s20, %s655_s15 }
 0x1fd   : > { %p657_p4 = pnand %p656_p2, %p913_p12 }
 0x1fe   : > { %p662_p6 = por %p661_p0, %p660_p7 }
 0x1ff   : > { %p658_p9 = pneg %p657_p4 }
 0x201   : > { %p663_p11 = pnand %p662_p6, %p658_p9 }
 0x203   : > { %666 = shalt.err (!%p663_p11)
}
 0x204   : > { %559 = dma.vmem_to_hbm [thread:$0]  (%p913_p12), %s469_s3, 128, %s466_s6, %s454_s7  }
 0x205 PF: > { %s480_s26 = sand.u32 1, %s693_s11   ;;  %p914_p13 = scmp.ne.s32.totalorder %s908_s23, 0 }
 0x206   : > { %p915_p1 = scmp.ge.s32.totalorder %s705_s14, 2  ;;  %s481_s27 = scalar_lea.sflag [#allocation7], %s480_s26 }
 0x208   : > { %p566_p3 = pnand %p915_p1, %p914_p13 }
 0x20a   : > { %p567_p5 = pneg %p566_p3 }
 0x20c   : > { %688 = dma.done.wait (%p567_p5), %s481_s27, 128  }
 0x20d   : > { %690 = vsyncadd (%p567_p5), %s481_s27, 4294967168  ;;  %p16_p8 = scmp.ge.s32.totalorder %s754_s16, 4   ;;  %s916_s11 = smov %s697_s12 }
 0x20e   : > { %s917_s12 = smov %s701_s13  ;;  %s918_s13 = smov %s766_s19 }
 0x20f   : > { %s919_s14 = smov %s754_s16  ;;  %18 = sbr.rel (!%p16_p8) target bundleno = 7 (0x7), region = 73 }
 0x214   :  { %486 = vsyncpa [#allocation6], 1 }
 0x215   :  { %488 = vsyncpa [#allocation6 + $0x1], 1 }
 0x216   :  { %489 = vsyncpa [#allocation7], 1 }
 0x217   :  { %491 = vsyncpa [#allocation7 + $0x1], 1 }

</bundles_post_ra>
